<compile_context>
chip_gen: v6e
topology: v6e:2x2x1
jax: 0.10.0
libtpu: 0.0.40
codegen_flags: <defaults>
</compile_context>

<pallas_src>
import functools

import jax
import jax.numpy as jnp
from jax import lax
from jax.experimental import pallas as pl
from jax.experimental.pallas import tpu as pltpu

_K1D = (0.05, 0.25, 0.4, 0.25, 0.05)   # deterministic weights from __init__
_K0, _K1, _K2 = 0.05, 0.25, 0.4        # symmetric-filter taps
_EPS = 1e-3                            # CharbonnierLoss eps


def _edge_loss_kernel(x_ref, y_ref, out_ref, *, W, eps):
    # Block layout: (1, H, L) with L = bp*W; planes sit side by side on the
    # lane axis, so lane % W is the within-plane column index.
    x = x_ref[0].astype(jnp.float32)                      # (H, L)
    y = y_ref[0].astype(jnp.float32)
    H, L = x.shape

    # Precomputed index masks, shared by every pass of both images.
    cm = lax.broadcasted_iota(jnp.int32, (H, L), 1) % W   # column within plane
    ri = lax.broadcasted_iota(jnp.int32, (H, L), 0)       # global row
    c_first = cm == 0
    c_last = cm == W - 1
    c_first2 = cm <= 1
    c_last2 = cm >= W - 2
    # "downsample -> *4 -> zero-insert" fused as an even-row/even-col mask.
    mask4 = jnp.where((ri % 2 == 0) & (cm % 2 == 0),
                      jnp.float32(4.0), jnp.float32(0.0))

    def hpass(a):
        # 5-tap conv along W (lane axis). Shifted copies keep the (H, L)
        # shape; the where fixups implement replicate padding at every plane
        # segment edge (which is also where cross-plane contamination from
        # the shift would land, so one fixup covers both).
        am1 = jnp.where(c_first, a,
                        jnp.concatenate([a[:, :1], a[:, :-1]], axis=1))
        ap1 = jnp.where(c_last, a,
                        jnp.concatenate([a[:, 1:], a[:, -1:]], axis=1))
        am2 = jnp.where(c_first2, am1,
                        jnp.concatenate([a[:, :2], a[:, :-2]], axis=1))
        ap2 = jnp.where(c_last2, ap1,
                        jnp.concatenate([a[:, 2:], a[:, -2:]], axis=1))
        return _K2 * a + _K1 * (am1 + ap1) + _K0 * (am2 + ap2)

    def vpass(a):
        # 5-tap conv along H (sublane axis); replicate padding is folded into
        # the same-shape shifted copies (block covers the full plane height).
        am1 = jnp.concatenate([a[:1], a[:-1]], axis=0)
        ap1 = jnp.concatenate([a[1:], a[-1:]], axis=0)
        am2 = jnp.concatenate([a[:1], a[:1], a[:-2]], axis=0)
        ap2 = jnp.concatenate([a[2:], a[-1:], a[-1:]], axis=0)
        return _K2 * a + _K1 * (am1 + ap1) + _K0 * (am2 + ap2)

    def gauss(a):
        return vpass(hpass(a))

    # TODO(synk): for H,W >= 128 the separable passes could be banded (HxH)/
    # (WxW) f32 matmuls on the otherwise-idle MXU; not triggered at these shapes.
    # TODO(synk): a parity-deinterleaved layout would let the second (75%-zero)
    # Gaussian skip its zero taps; with interleaved SIMD lanes they are free-ish.
    def lap(img):
        return img - gauss(gauss(img) * mask4)

    d = lap(x) - lap(y)
    charb = jnp.sqrt(d * d + eps * eps)
    # Per-lane partial sums only; lane/block reduction finishes in JAX.
    out_ref[0] = jnp.sum(charb, axis=0, keepdims=True)


@functools.lru_cache(maxsize=None)
def _vmem_limit_bytes():
    cap = 64 * 1024 * 1024
    try:
        info = pltpu.get_tpu_info()
        cap = int(getattr(info, "vmem_capacity_bytes", cap) or cap)
    except Exception:
        pass
    # Leave headroom on v7x's 64 MiB parts; allow ~100 MiB on 128 MiB parts.
    return min(cap * 3 // 4, 100 * 1024 * 1024)


def _choose_bp(P, H, W, budget_bytes):
    """Planes per block: prefer grid>=2 (megacore), then maximal lane fill."""
    def padded_block_bytes(b):
        sub = -(-H // 8) * 8
        lanes = -(-(b * W) // 128) * 128
        return sub * lanes * 4
    best_key, best_b = None, 1
    for b in range(1, P + 1):
        if P % b:
            continue
        # 2 inputs x 2 pipeline buffers + ~10 f32 conv temporaries per block.
        if 14 * padded_block_bytes(b) > budget_bytes:
            continue
        key = (1 if P // b >= 2 else 0, b)
        if best_key is None or key > best_key:
            best_key, best_b = key, b
    return best_b


@jax.jit
def edge_loss(x, y):
    N, C, H, W = x.shape
    P = N * C
    budget = _vmem_limit_bytes()
    bp = _choose_bp(P, H, W, budget)
    G = P // bp
    Lb = bp * W
    # TODO(synk): very large single planes (H*W*4 comparable to VMEM) would
    # need spatial row tiling with a 4-row halo and even-row-aligned tiles.

    def pack(a):
        # (N,C,H,W) -> (G, H, bp*W): planes side by side on the lane axis.
        return (a.reshape(G, bp, H, W)
                 .transpose(0, 2, 1, 3)
                 .reshape(G, H, Lb)
                 .astype(jnp.float32))

    xf, yf = pack(x), pack(y)
    kern = functools.partial(_edge_loss_kernel, W=W, eps=_EPS)
    partials = pl.pallas_call(
        kern,
        out_shape=jax.ShapeDtypeStruct((G, 1, Lb), jnp.float32),
        grid=(G,),
        in_specs=[pl.BlockSpec((1, H, Lb), lambda i: (i, 0, 0)),
                  pl.BlockSpec((1, H, Lb), lambda i: (i, 0, 0))],
        out_specs=pl.BlockSpec((1, 1, Lb), lambda i: (i, 0, 0)),
        compiler_params=pltpu.CompilerParams(
            dimension_semantics=("parallel",),
            vmem_limit_bytes=budget),
    )(xf, yf)

    return jnp.sum(partials) / (N * C * H * W)


# ---------------------------------------------------------------------------
# Pure-JAX reference (mirrors the PyTorch module) for a correctness check.
# ---------------------------------------------------------------------------
def _edge_loss_ref(x, y):
    k1 = jnp.asarray(_K1D, dtype=jnp.float32)
    k2 = jnp.outer(k1, k1)
    C = x.shape[1]
    w = jnp.broadcast_to(k2, (C, 1, 5, 5))

    def conv_gauss(img):
        imgp = jnp.pad(img, ((0, 0), (0, 0), (2, 2), (2, 2)), mode="edge")
        return lax.conv_general_dilated(
            imgp, w, window_strides=(1, 1), padding="VALID",
            dimension_numbers=("NCHW", "OIHW", "NCHW"), feature_group_count=C)

    def lap(img):
        f = conv_gauss(img)
        nf = jnp.zeros_like(f).at[:, :, ::2, ::2].set(f[:, :, ::2, ::2] * 4.0)
        return img - conv_gauss(nf)

    d = lap(x) - lap(y)
    return jnp.mean(jnp.sqrt(d * d + _EPS * _EPS))


if __name__ == "__main__":
    key = jax.random.PRNGKey(0)
    kx, ky = jax.random.split(key)
    # EdgeLoss repeats its 5x5 Gaussian 3x with groups=3 -> inputs have 3 channels.
    x = jax.random.normal(kx, (2, 3, 16, 16), dtype=jnp.float32)
    y = jax.random.normal(ky, (2, 3, 16, 16), dtype=jnp.float32)

    loss = jax.block_until_ready(edge_loss(x, y))
    ref = jax.block_until_ready(_edge_loss_ref(x, y))

    assert jnp.allclose(loss, ref, rtol=5e-5, atol=1e-6), (loss, ref)
    print("KERNEL_OK")
</pallas_src>

<mosaic_0001>
module attributes {stable_mosaic.version = 11 : i64} {
  func.func @_edge_loss_kernel(%arg0: i32, %arg1: memref<1x16x48xf32, #tpu.memory_space<vmem>>, %arg2: memref<1x16x48xf32, #tpu.memory_space<vmem>>, %arg3: memref<1x1x48xf32, #tpu.memory_space<vmem>>) attributes {dimension_semantics = [#tpu.dimension_semantics<parallel>], iteration_bounds = array<i64: 2>, scalar_prefetch = 0 : i64, scratch_operands = 0 : i64, tpu.core_type = #tpu.core_type<tc>, window_params = [{transform_indices = @transform_0, window_bounds = array<i64: 1, 16, 48>}, {transform_indices = @transform_1, window_bounds = array<i64: 1, 16, 48>}, {transform_indices = @transform_2, window_bounds = array<i64: 1, 1, 48>}]} {
    %c0 = arith.constant 0 : index
    %c0_0 = arith.constant 0 : index
    %c0_1 = arith.constant 0 : index
    %0 = vector.load %arg1[%c0, %c0_0, %c0_1] : memref<1x16x48xf32, #tpu.memory_space<vmem>>, vector<1x16x48xf32>
    %1 = vector.shape_cast %0 : vector<1x16x48xf32> to vector<16x48xf32>
    %c0_2 = arith.constant 0 : index
    %c0_3 = arith.constant 0 : index
    %c0_4 = arith.constant 0 : index
    %2 = vector.load %arg2[%c0_2, %c0_3, %c0_4] : memref<1x16x48xf32, #tpu.memory_space<vmem>>, vector<1x16x48xf32>
    %3 = vector.shape_cast %2 : vector<1x16x48xf32> to vector<16x48xf32>
    %4 = tpu.iota {dimensions = array<i32: 1>} : vector<16x48xi32>
    %c16_i32 = arith.constant 16 : i32
    %c0_i32 = arith.constant 0 : i32
    %5 = arith.cmpi eq, %c16_i32, %c0_i32 : i32
    %c1_i32 = arith.constant 1 : i32
    %6 = arith.select %5, %c1_i32, %c16_i32 : i32
    %7 = vector.broadcast %6 : i32 to vector<16x48xi32>
    %8 = arith.remsi %4, %7 : vector<16x48xi32>
    %c0_i32_5 = arith.constant 0 : i32
    %9 = vector.broadcast %c0_i32_5 : i32 to vector<16x48xi32>
    %10 = arith.cmpi ne, %8, %9 : vector<16x48xi32>
    %c0_i32_6 = arith.constant 0 : i32
    %11 = vector.broadcast %c0_i32_6 : i32 to vector<16x48xi32>
    %12 = arith.cmpi slt, %8, %11 : vector<16x48xi32>
    %c0_i32_7 = arith.constant 0 : i32
    %13 = arith.cmpi slt, %6, %c0_i32_7 : i32
    %14 = vector.broadcast %13 : i1 to vector<16x48xi1>
    %15 = vector.broadcast %14 : vector<16x48xi1> to vector<16x48xi1>
    %16 = arith.xori %12, %15 : vector<16x48xi1>
    %17 = arith.andi %16, %10 : vector<16x48xi1>
    %18 = vector.broadcast %6 : i32 to vector<16x48xi32>
    %19 = arith.addi %8, %18 : vector<16x48xi32>
    %20 = arith.select %17, %19, %8 : vector<16x48xi1>, vector<16x48xi32>
    %21 = tpu.iota {dimensions = array<i32: 0>} : vector<16x48xi32>
    %c0_i32_8 = arith.constant 0 : i32
    %22 = vector.broadcast %c0_i32_8 : i32 to vector<16x48xi32>
    %23 = arith.cmpi eq, %20, %22 : vector<16x48xi32>
    %c15_i32 = arith.constant 15 : i32
    %24 = vector.broadcast %c15_i32 : i32 to vector<16x48xi32>
    %25 = arith.cmpi eq, %20, %24 : vector<16x48xi32>
    %c1_i32_9 = arith.constant 1 : i32
    %26 = vector.broadcast %c1_i32_9 : i32 to vector<16x48xi32>
    %27 = arith.cmpi sle, %20, %26 : vector<16x48xi32>
    %c14_i32 = arith.constant 14 : i32
    %28 = vector.broadcast %c14_i32 : i32 to vector<16x48xi32>
    %29 = arith.cmpi sge, %20, %28 : vector<16x48xi32>
    %c2_i32 = arith.constant 2 : i32
    %c0_i32_10 = arith.constant 0 : i32
    %30 = arith.cmpi eq, %c2_i32, %c0_i32_10 : i32
    %c1_i32_11 = arith.constant 1 : i32
    %31 = arith.select %30, %c1_i32_11, %c2_i32 : i32
    %32 = vector.broadcast %31 : i32 to vector<16x48xi32>
    %33 = arith.remsi %21, %32 : vector<16x48xi32>
    %c0_i32_12 = arith.constant 0 : i32
    %34 = vector.broadcast %c0_i32_12 : i32 to vector<16x48xi32>
    %35 = arith.cmpi ne, %33, %34 : vector<16x48xi32>
    %c0_i32_13 = arith.constant 0 : i32
    %36 = vector.broadcast %c0_i32_13 : i32 to vector<16x48xi32>
    %37 = arith.cmpi slt, %33, %36 : vector<16x48xi32>
    %c0_i32_14 = arith.constant 0 : i32
    %38 = arith.cmpi slt, %31, %c0_i32_14 : i32
    %39 = vector.broadcast %38 : i1 to vector<16x48xi1>
    %40 = vector.broadcast %39 : vector<16x48xi1> to vector<16x48xi1>
    %41 = arith.xori %37, %40 : vector<16x48xi1>
    %42 = arith.andi %41, %35 : vector<16x48xi1>
    %43 = vector.broadcast %31 : i32 to vector<16x48xi32>
    %44 = arith.addi %33, %43 : vector<16x48xi32>
    %45 = arith.select %42, %44, %33 : vector<16x48xi1>, vector<16x48xi32>
    %c0_i32_15 = arith.constant 0 : i32
    %46 = vector.broadcast %c0_i32_15 : i32 to vector<16x48xi32>
    %47 = arith.cmpi eq, %45, %46 : vector<16x48xi32>
    %c2_i32_16 = arith.constant 2 : i32
    %c0_i32_17 = arith.constant 0 : i32
    %48 = arith.cmpi eq, %c2_i32_16, %c0_i32_17 : i32
    %c1_i32_18 = arith.constant 1 : i32
    %49 = arith.select %48, %c1_i32_18, %c2_i32_16 : i32
    %50 = vector.broadcast %49 : i32 to vector<16x48xi32>
    %51 = arith.remsi %20, %50 : vector<16x48xi32>
    %c0_i32_19 = arith.constant 0 : i32
    %52 = vector.broadcast %c0_i32_19 : i32 to vector<16x48xi32>
    %53 = arith.cmpi ne, %51, %52 : vector<16x48xi32>
    %c0_i32_20 = arith.constant 0 : i32
    %54 = vector.broadcast %c0_i32_20 : i32 to vector<16x48xi32>
    %55 = arith.cmpi slt, %51, %54 : vector<16x48xi32>
    %c0_i32_21 = arith.constant 0 : i32
    %56 = arith.cmpi slt, %49, %c0_i32_21 : i32
    %57 = vector.broadcast %56 : i1 to vector<16x48xi1>
    %58 = vector.broadcast %57 : vector<16x48xi1> to vector<16x48xi1>
    %59 = arith.xori %55, %58 : vector<16x48xi1>
    %60 = arith.andi %59, %53 : vector<16x48xi1>
    %61 = vector.broadcast %49 : i32 to vector<16x48xi32>
    %62 = arith.addi %51, %61 : vector<16x48xi32>
    %63 = arith.select %60, %62, %51 : vector<16x48xi1>, vector<16x48xi32>
    %c0_i32_22 = arith.constant 0 : i32
    %64 = vector.broadcast %c0_i32_22 : i32 to vector<16x48xi32>
    %65 = arith.cmpi eq, %63, %64 : vector<16x48xi32>
    %66 = arith.andi %47, %65 : vector<16x48xi1>
    %cst = arith.constant 4.000000e+00 : f32
    %cst_23 = arith.constant 0.000000e+00 : f32
    %67 = vector.broadcast %cst : f32 to vector<16x48xf32>
    %68 = vector.broadcast %cst_23 : f32 to vector<16x48xf32>
    %69 = arith.select %66, %67, %68 : vector<16x48xi1>, vector<16x48xf32>
    %70 = vector.extract_strided_slice %1 {offsets = [0, 0], sizes = [16, 1], strides = [1, 1]} : vector<16x48xf32> to vector<16x1xf32>
    %71 = vector.extract_strided_slice %1 {offsets = [0, 0], sizes = [16, 47], strides = [1, 1]} : vector<16x48xf32> to vector<16x47xf32>
    %72 = tpu.concatenate %70, %71 in 1 : vector<16x1xf32>, vector<16x47xf32> -> vector<16x48xf32>
    %73 = arith.select %23, %1, %72 : vector<16x48xi1>, vector<16x48xf32>
    %74 = vector.extract_strided_slice %1 {offsets = [0, 1], sizes = [16, 47], strides = [1, 1]} : vector<16x48xf32> to vector<16x47xf32>
    %75 = vector.extract_strided_slice %1 {offsets = [0, 47], sizes = [16, 1], strides = [1, 1]} : vector<16x48xf32> to vector<16x1xf32>
    %76 = tpu.concatenate %74, %75 in 1 : vector<16x47xf32>, vector<16x1xf32> -> vector<16x48xf32>
    %77 = arith.select %25, %1, %76 : vector<16x48xi1>, vector<16x48xf32>
    %78 = vector.extract_strided_slice %1 {offsets = [0, 0], sizes = [16, 2], strides = [1, 1]} : vector<16x48xf32> to vector<16x2xf32>
    %79 = vector.extract_strided_slice %1 {offsets = [0, 0], sizes = [16, 46], strides = [1, 1]} : vector<16x48xf32> to vector<16x46xf32>
    %80 = tpu.concatenate %78, %79 in 1 : vector<16x2xf32>, vector<16x46xf32> -> vector<16x48xf32>
    %81 = arith.select %27, %73, %80 : vector<16x48xi1>, vector<16x48xf32>
    %82 = vector.extract_strided_slice %1 {offsets = [0, 2], sizes = [16, 46], strides = [1, 1]} : vector<16x48xf32> to vector<16x46xf32>
    %83 = vector.extract_strided_slice %1 {offsets = [0, 46], sizes = [16, 2], strides = [1, 1]} : vector<16x48xf32> to vector<16x2xf32>
    %84 = tpu.concatenate %82, %83 in 1 : vector<16x46xf32>, vector<16x2xf32> -> vector<16x48xf32>
    %85 = arith.select %29, %77, %84 : vector<16x48xi1>, vector<16x48xf32>
    %cst_24 = arith.constant 4.000000e-01 : f32
    %86 = vector.broadcast %cst_24 : f32 to vector<16x48xf32>
    %87 = arith.mulf %86, %1 : vector<16x48xf32>
    %88 = arith.addf %73, %77 : vector<16x48xf32>
    %cst_25 = arith.constant 2.500000e-01 : f32
    %89 = vector.broadcast %cst_25 : f32 to vector<16x48xf32>
    %90 = arith.mulf %89, %88 : vector<16x48xf32>
    %91 = arith.addf %87, %90 : vector<16x48xf32>
    %92 = arith.addf %81, %85 : vector<16x48xf32>
    %cst_26 = arith.constant 5.000000e-02 : f32
    %93 = vector.broadcast %cst_26 : f32 to vector<16x48xf32>
    %94 = arith.mulf %93, %92 : vector<16x48xf32>
    %95 = arith.addf %91, %94 : vector<16x48xf32>
    %96 = vector.extract_strided_slice %95 {offsets = [0, 0], sizes = [1, 48], strides = [1, 1]} : vector<16x48xf32> to vector<1x48xf32>
    %97 = vector.extract_strided_slice %95 {offsets = [0, 0], sizes = [15, 48], strides = [1, 1]} : vector<16x48xf32> to vector<15x48xf32>
    %98 = tpu.concatenate %96, %97 in 0 : vector<1x48xf32>, vector<15x48xf32> -> vector<16x48xf32>
    %99 = vector.extract_strided_slice %95 {offsets = [1, 0], sizes = [15, 48], strides = [1, 1]} : vector<16x48xf32> to vector<15x48xf32>
    %100 = vector.extract_strided_slice %95 {offsets = [15, 0], sizes = [1, 48], strides = [1, 1]} : vector<16x48xf32> to vector<1x48xf32>
    %101 = tpu.concatenate %99, %100 in 0 : vector<15x48xf32>, vector<1x48xf32> -> vector<16x48xf32>
    %102 = vector.extract_strided_slice %95 {offsets = [0, 0], sizes = [1, 48], strides = [1, 1]} : vector<16x48xf32> to vector<1x48xf32>
    %103 = vector.extract_strided_slice %95 {offsets = [0, 0], sizes = [1, 48], strides = [1, 1]} : vector<16x48xf32> to vector<1x48xf32>
    %104 = vector.extract_strided_slice %95 {offsets = [0, 0], sizes = [14, 48], strides = [1, 1]} : vector<16x48xf32> to vector<14x48xf32>
    %105 = tpu.concatenate %102, %103, %104 in 0 : vector<1x48xf32>, vector<1x48xf32>, vector<14x48xf32> -> vector<16x48xf32>
    %106 = vector.extract_strided_slice %95 {offsets = [2, 0], sizes = [14, 48], strides = [1, 1]} : vector<16x48xf32> to vector<14x48xf32>
    %107 = vector.extract_strided_slice %95 {offsets = [15, 0], sizes = [1, 48], strides = [1, 1]} : vector<16x48xf32> to vector<1x48xf32>
    %108 = vector.extract_strided_slice %95 {offsets = [15, 0], sizes = [1, 48], strides = [1, 1]} : vector<16x48xf32> to vector<1x48xf32>
    %109 = tpu.concatenate %106, %107, %108 in 0 : vector<14x48xf32>, vector<1x48xf32>, vector<1x48xf32> -> vector<16x48xf32>
    %cst_27 = arith.constant 4.000000e-01 : f32
    %110 = vector.broadcast %cst_27 : f32 to vector<16x48xf32>
    %111 = arith.mulf %110, %95 : vector<16x48xf32>
    %112 = arith.addf %98, %101 : vector<16x48xf32>
    %cst_28 = arith.constant 2.500000e-01 : f32
    %113 = vector.broadcast %cst_28 : f32 to vector<16x48xf32>
    %114 = arith.mulf %113, %112 : vector<16x48xf32>
    %115 = arith.addf %111, %114 : vector<16x48xf32>
    %116 = arith.addf %105, %109 : vector<16x48xf32>
    %cst_29 = arith.constant 5.000000e-02 : f32
    %117 = vector.broadcast %cst_29 : f32 to vector<16x48xf32>
    %118 = arith.mulf %117, %116 : vector<16x48xf32>
    %119 = arith.addf %115, %118 : vector<16x48xf32>
    %120 = arith.mulf %119, %69 : vector<16x48xf32>
    %121 = vector.extract_strided_slice %120 {offsets = [0, 0], sizes = [16, 1], strides = [1, 1]} : vector<16x48xf32> to vector<16x1xf32>
    %122 = vector.extract_strided_slice %120 {offsets = [0, 0], sizes = [16, 47], strides = [1, 1]} : vector<16x48xf32> to vector<16x47xf32>
    %123 = tpu.concatenate %121, %122 in 1 : vector<16x1xf32>, vector<16x47xf32> -> vector<16x48xf32>
    %124 = arith.select %23, %120, %123 : vector<16x48xi1>, vector<16x48xf32>
    %125 = vector.extract_strided_slice %120 {offsets = [0, 1], sizes = [16, 47], strides = [1, 1]} : vector<16x48xf32> to vector<16x47xf32>
    %126 = vector.extract_strided_slice %120 {offsets = [0, 47], sizes = [16, 1], strides = [1, 1]} : vector<16x48xf32> to vector<16x1xf32>
    %127 = tpu.concatenate %125, %126 in 1 : vector<16x47xf32>, vector<16x1xf32> -> vector<16x48xf32>
    %128 = arith.select %25, %120, %127 : vector<16x48xi1>, vector<16x48xf32>
    %129 = vector.extract_strided_slice %120 {offsets = [0, 0], sizes = [16, 2], strides = [1, 1]} : vector<16x48xf32> to vector<16x2xf32>
    %130 = vector.extract_strided_slice %120 {offsets = [0, 0], sizes = [16, 46], strides = [1, 1]} : vector<16x48xf32> to vector<16x46xf32>
    %131 = tpu.concatenate %129, %130 in 1 : vector<16x2xf32>, vector<16x46xf32> -> vector<16x48xf32>
    %132 = arith.select %27, %124, %131 : vector<16x48xi1>, vector<16x48xf32>
    %133 = vector.extract_strided_slice %120 {offsets = [0, 2], sizes = [16, 46], strides = [1, 1]} : vector<16x48xf32> to vector<16x46xf32>
    %134 = vector.extract_strided_slice %120 {offsets = [0, 46], sizes = [16, 2], strides = [1, 1]} : vector<16x48xf32> to vector<16x2xf32>
    %135 = tpu.concatenate %133, %134 in 1 : vector<16x46xf32>, vector<16x2xf32> -> vector<16x48xf32>
    %136 = arith.select %29, %128, %135 : vector<16x48xi1>, vector<16x48xf32>
    %cst_30 = arith.constant 4.000000e-01 : f32
    %137 = vector.broadcast %cst_30 : f32 to vector<16x48xf32>
    %138 = arith.mulf %137, %120 : vector<16x48xf32>
    %139 = arith.addf %124, %128 : vector<16x48xf32>
    %cst_31 = arith.constant 2.500000e-01 : f32
    %140 = vector.broadcast %cst_31 : f32 to vector<16x48xf32>
    %141 = arith.mulf %140, %139 : vector<16x48xf32>
    %142 = arith.addf %138, %141 : vector<16x48xf32>
    %143 = arith.addf %132, %136 : vector<16x48xf32>
    %cst_32 = arith.constant 5.000000e-02 : f32
    %144 = vector.broadcast %cst_32 : f32 to vector<16x48xf32>
    %145 = arith.mulf %144, %143 : vector<16x48xf32>
    %146 = arith.addf %142, %145 : vector<16x48xf32>
    %147 = vector.extract_strided_slice %146 {offsets = [0, 0], sizes = [1, 48], strides = [1, 1]} : vector<16x48xf32> to vector<1x48xf32>
    %148 = vector.extract_strided_slice %146 {offsets = [0, 0], sizes = [15, 48], strides = [1, 1]} : vector<16x48xf32> to vector<15x48xf32>
    %149 = tpu.concatenate %147, %148 in 0 : vector<1x48xf32>, vector<15x48xf32> -> vector<16x48xf32>
    %150 = vector.extract_strided_slice %146 {offsets = [1, 0], sizes = [15, 48], strides = [1, 1]} : vector<16x48xf32> to vector<15x48xf32>
    %151 = vector.extract_strided_slice %146 {offsets = [15, 0], sizes = [1, 48], strides = [1, 1]} : vector<16x48xf32> to vector<1x48xf32>
    %152 = tpu.concatenate %150, %151 in 0 : vector<15x48xf32>, vector<1x48xf32> -> vector<16x48xf32>
    %153 = vector.extract_strided_slice %146 {offsets = [0, 0], sizes = [1, 48], strides = [1, 1]} : vector<16x48xf32> to vector<1x48xf32>
    %154 = vector.extract_strided_slice %146 {offsets = [0, 0], sizes = [1, 48], strides = [1, 1]} : vector<16x48xf32> to vector<1x48xf32>
    %155 = vector.extract_strided_slice %146 {offsets = [0, 0], sizes = [14, 48], strides = [1, 1]} : vector<16x48xf32> to vector<14x48xf32>
    %156 = tpu.concatenate %153, %154, %155 in 0 : vector<1x48xf32>, vector<1x48xf32>, vector<14x48xf32> -> vector<16x48xf32>
    %157 = vector.extract_strided_slice %146 {offsets = [2, 0], sizes = [14, 48], strides = [1, 1]} : vector<16x48xf32> to vector<14x48xf32>
    %158 = vector.extract_strided_slice %146 {offsets = [15, 0], sizes = [1, 48], strides = [1, 1]} : vector<16x48xf32> to vector<1x48xf32>
    %159 = vector.extract_strided_slice %146 {offsets = [15, 0], sizes = [1, 48], strides = [1, 1]} : vector<16x48xf32> to vector<1x48xf32>
    %160 = tpu.concatenate %157, %158, %159 in 0 : vector<14x48xf32>, vector<1x48xf32>, vector<1x48xf32> -> vector<16x48xf32>
    %cst_33 = arith.constant 4.000000e-01 : f32
    %161 = vector.broadcast %cst_33 : f32 to vector<16x48xf32>
    %162 = arith.mulf %161, %146 : vector<16x48xf32>
    %163 = arith.addf %149, %152 : vector<16x48xf32>
    %cst_34 = arith.constant 2.500000e-01 : f32
    %164 = vector.broadcast %cst_34 : f32 to vector<16x48xf32>
    %165 = arith.mulf %164, %163 : vector<16x48xf32>
    %166 = arith.addf %162, %165 : vector<16x48xf32>
    %167 = arith.addf %156, %160 : vector<16x48xf32>
    %cst_35 = arith.constant 5.000000e-02 : f32
    %168 = vector.broadcast %cst_35 : f32 to vector<16x48xf32>
    %169 = arith.mulf %168, %167 : vector<16x48xf32>
    %170 = arith.addf %166, %169 : vector<16x48xf32>
    %171 = arith.subf %1, %170 : vector<16x48xf32>
    %172 = vector.extract_strided_slice %3 {offsets = [0, 0], sizes = [16, 1], strides = [1, 1]} : vector<16x48xf32> to vector<16x1xf32>
    %173 = vector.extract_strided_slice %3 {offsets = [0, 0], sizes = [16, 47], strides = [1, 1]} : vector<16x48xf32> to vector<16x47xf32>
    %174 = tpu.concatenate %172, %173 in 1 : vector<16x1xf32>, vector<16x47xf32> -> vector<16x48xf32>
    %175 = arith.select %23, %3, %174 : vector<16x48xi1>, vector<16x48xf32>
    %176 = vector.extract_strided_slice %3 {offsets = [0, 1], sizes = [16, 47], strides = [1, 1]} : vector<16x48xf32> to vector<16x47xf32>
    %177 = vector.extract_strided_slice %3 {offsets = [0, 47], sizes = [16, 1], strides = [1, 1]} : vector<16x48xf32> to vector<16x1xf32>
    %178 = tpu.concatenate %176, %177 in 1 : vector<16x47xf32>, vector<16x1xf32> -> vector<16x48xf32>
    %179 = arith.select %25, %3, %178 : vector<16x48xi1>, vector<16x48xf32>
    %180 = vector.extract_strided_slice %3 {offsets = [0, 0], sizes = [16, 2], strides = [1, 1]} : vector<16x48xf32> to vector<16x2xf32>
    %181 = vector.extract_strided_slice %3 {offsets = [0, 0], sizes = [16, 46], strides = [1, 1]} : vector<16x48xf32> to vector<16x46xf32>
    %182 = tpu.concatenate %180, %181 in 1 : vector<16x2xf32>, vector<16x46xf32> -> vector<16x48xf32>
    %183 = arith.select %27, %175, %182 : vector<16x48xi1>, vector<16x48xf32>
    %184 = vector.extract_strided_slice %3 {offsets = [0, 2], sizes = [16, 46], strides = [1, 1]} : vector<16x48xf32> to vector<16x46xf32>
    %185 = vector.extract_strided_slice %3 {offsets = [0, 46], sizes = [16, 2], strides = [1, 1]} : vector<16x48xf32> to vector<16x2xf32>
    %186 = tpu.concatenate %184, %185 in 1 : vector<16x46xf32>, vector<16x2xf32> -> vector<16x48xf32>
    %187 = arith.select %29, %179, %186 : vector<16x48xi1>, vector<16x48xf32>
    %cst_36 = arith.constant 4.000000e-01 : f32
    %188 = vector.broadcast %cst_36 : f32 to vector<16x48xf32>
    %189 = arith.mulf %188, %3 : vector<16x48xf32>
    %190 = arith.addf %175, %179 : vector<16x48xf32>
    %cst_37 = arith.constant 2.500000e-01 : f32
    %191 = vector.broadcast %cst_37 : f32 to vector<16x48xf32>
    %192 = arith.mulf %191, %190 : vector<16x48xf32>
    %193 = arith.addf %189, %192 : vector<16x48xf32>
    %194 = arith.addf %183, %187 : vector<16x48xf32>
    %cst_38 = arith.constant 5.000000e-02 : f32
    %195 = vector.broadcast %cst_38 : f32 to vector<16x48xf32>
    %196 = arith.mulf %195, %194 : vector<16x48xf32>
    %197 = arith.addf %193, %196 : vector<16x48xf32>
    %198 = vector.extract_strided_slice %197 {offsets = [0, 0], sizes = [1, 48], strides = [1, 1]} : vector<16x48xf32> to vector<1x48xf32>
    %199 = vector.extract_strided_slice %197 {offsets = [0, 0], sizes = [15, 48], strides = [1, 1]} : vector<16x48xf32> to vector<15x48xf32>
    %200 = tpu.concatenate %198, %199 in 0 : vector<1x48xf32>, vector<15x48xf32> -> vector<16x48xf32>
    %201 = vector.extract_strided_slice %197 {offsets = [1, 0], sizes = [15, 48], strides = [1, 1]} : vector<16x48xf32> to vector<15x48xf32>
    %202 = vector.extract_strided_slice %197 {offsets = [15, 0], sizes = [1, 48], strides = [1, 1]} : vector<16x48xf32> to vector<1x48xf32>
    %203 = tpu.concatenate %201, %202 in 0 : vector<15x48xf32>, vector<1x48xf32> -> vector<16x48xf32>
    %204 = vector.extract_strided_slice %197 {offsets = [0, 0], sizes = [1, 48], strides = [1, 1]} : vector<16x48xf32> to vector<1x48xf32>
    %205 = vector.extract_strided_slice %197 {offsets = [0, 0], sizes = [1, 48], strides = [1, 1]} : vector<16x48xf32> to vector<1x48xf32>
    %206 = vector.extract_strided_slice %197 {offsets = [0, 0], sizes = [14, 48], strides = [1, 1]} : vector<16x48xf32> to vector<14x48xf32>
    %207 = tpu.concatenate %204, %205, %206 in 0 : vector<1x48xf32>, vector<1x48xf32>, vector<14x48xf32> -> vector<16x48xf32>
    %208 = vector.extract_strided_slice %197 {offsets = [2, 0], sizes = [14, 48], strides = [1, 1]} : vector<16x48xf32> to vector<14x48xf32>
    %209 = vector.extract_strided_slice %197 {offsets = [15, 0], sizes = [1, 48], strides = [1, 1]} : vector<16x48xf32> to vector<1x48xf32>
    %210 = vector.extract_strided_slice %197 {offsets = [15, 0], sizes = [1, 48], strides = [1, 1]} : vector<16x48xf32> to vector<1x48xf32>
    %211 = tpu.concatenate %208, %209, %210 in 0 : vector<14x48xf32>, vector<1x48xf32>, vector<1x48xf32> -> vector<16x48xf32>
    %cst_39 = arith.constant 4.000000e-01 : f32
    %212 = vector.broadcast %cst_39 : f32 to vector<16x48xf32>
    %213 = arith.mulf %212, %197 : vector<16x48xf32>
    %214 = arith.addf %200, %203 : vector<16x48xf32>
    %cst_40 = arith.constant 2.500000e-01 : f32
    %215 = vector.broadcast %cst_40 : f32 to vector<16x48xf32>
    %216 = arith.mulf %215, %214 : vector<16x48xf32>
    %217 = arith.addf %213, %216 : vector<16x48xf32>
    %218 = arith.addf %207, %211 : vector<16x48xf32>
    %cst_41 = arith.constant 5.000000e-02 : f32
    %219 = vector.broadcast %cst_41 : f32 to vector<16x48xf32>
    %220 = arith.mulf %219, %218 : vector<16x48xf32>
    %221 = arith.addf %217, %220 : vector<16x48xf32>
    %222 = arith.mulf %221, %69 : vector<16x48xf32>
    %223 = vector.extract_strided_slice %222 {offsets = [0, 0], sizes = [16, 1], strides = [1, 1]} : vector<16x48xf32> to vector<16x1xf32>
    %224 = vector.extract_strided_slice %222 {offsets = [0, 0], sizes = [16, 47], strides = [1, 1]} : vector<16x48xf32> to vector<16x47xf32>
    %225 = tpu.concatenate %223, %224 in 1 : vector<16x1xf32>, vector<16x47xf32> -> vector<16x48xf32>
    %226 = arith.select %23, %222, %225 : vector<16x48xi1>, vector<16x48xf32>
    %227 = vector.extract_strided_slice %222 {offsets = [0, 1], sizes = [16, 47], strides = [1, 1]} : vector<16x48xf32> to vector<16x47xf32>
    %228 = vector.extract_strided_slice %222 {offsets = [0, 47], sizes = [16, 1], strides = [1, 1]} : vector<16x48xf32> to vector<16x1xf32>
    %229 = tpu.concatenate %227, %228 in 1 : vector<16x47xf32>, vector<16x1xf32> -> vector<16x48xf32>
    %230 = arith.select %25, %222, %229 : vector<16x48xi1>, vector<16x48xf32>
    %231 = vector.extract_strided_slice %222 {offsets = [0, 0], sizes = [16, 2], strides = [1, 1]} : vector<16x48xf32> to vector<16x2xf32>
    %232 = vector.extract_strided_slice %222 {offsets = [0, 0], sizes = [16, 46], strides = [1, 1]} : vector<16x48xf32> to vector<16x46xf32>
    %233 = tpu.concatenate %231, %232 in 1 : vector<16x2xf32>, vector<16x46xf32> -> vector<16x48xf32>
    %234 = arith.select %27, %226, %233 : vector<16x48xi1>, vector<16x48xf32>
    %235 = vector.extract_strided_slice %222 {offsets = [0, 2], sizes = [16, 46], strides = [1, 1]} : vector<16x48xf32> to vector<16x46xf32>
    %236 = vector.extract_strided_slice %222 {offsets = [0, 46], sizes = [16, 2], strides = [1, 1]} : vector<16x48xf32> to vector<16x2xf32>
    %237 = tpu.concatenate %235, %236 in 1 : vector<16x46xf32>, vector<16x2xf32> -> vector<16x48xf32>
    %238 = arith.select %29, %230, %237 : vector<16x48xi1>, vector<16x48xf32>
    %cst_42 = arith.constant 4.000000e-01 : f32
    %239 = vector.broadcast %cst_42 : f32 to vector<16x48xf32>
    %240 = arith.mulf %239, %222 : vector<16x48xf32>
    %241 = arith.addf %226, %230 : vector<16x48xf32>
    %cst_43 = arith.constant 2.500000e-01 : f32
    %242 = vector.broadcast %cst_43 : f32 to vector<16x48xf32>
    %243 = arith.mulf %242, %241 : vector<16x48xf32>
    %244 = arith.addf %240, %243 : vector<16x48xf32>
    %245 = arith.addf %234, %238 : vector<16x48xf32>
    %cst_44 = arith.constant 5.000000e-02 : f32
    %246 = vector.broadcast %cst_44 : f32 to vector<16x48xf32>
    %247 = arith.mulf %246, %245 : vector<16x48xf32>
    %248 = arith.addf %244, %247 : vector<16x48xf32>
    %249 = vector.extract_strided_slice %248 {offsets = [0, 0], sizes = [1, 48], strides = [1, 1]} : vector<16x48xf32> to vector<1x48xf32>
    %250 = vector.extract_strided_slice %248 {offsets = [0, 0], sizes = [15, 48], strides = [1, 1]} : vector<16x48xf32> to vector<15x48xf32>
    %251 = tpu.concatenate %249, %250 in 0 : vector<1x48xf32>, vector<15x48xf32> -> vector<16x48xf32>
    %252 = vector.extract_strided_slice %248 {offsets = [1, 0], sizes = [15, 48], strides = [1, 1]} : vector<16x48xf32> to vector<15x48xf32>
    %253 = vector.extract_strided_slice %248 {offsets = [15, 0], sizes = [1, 48], strides = [1, 1]} : vector<16x48xf32> to vector<1x48xf32>
    %254 = tpu.concatenate %252, %253 in 0 : vector<15x48xf32>, vector<1x48xf32> -> vector<16x48xf32>
    %255 = vector.extract_strided_slice %248 {offsets = [0, 0], sizes = [1, 48], strides = [1, 1]} : vector<16x48xf32> to vector<1x48xf32>
    %256 = vector.extract_strided_slice %248 {offsets = [0, 0], sizes = [1, 48], strides = [1, 1]} : vector<16x48xf32> to vector<1x48xf32>
    %257 = vector.extract_strided_slice %248 {offsets = [0, 0], sizes = [14, 48], strides = [1, 1]} : vector<16x48xf32> to vector<14x48xf32>
    %258 = tpu.concatenate %255, %256, %257 in 0 : vector<1x48xf32>, vector<1x48xf32>, vector<14x48xf32> -> vector<16x48xf32>
    %259 = vector.extract_strided_slice %248 {offsets = [2, 0], sizes = [14, 48], strides = [1, 1]} : vector<16x48xf32> to vector<14x48xf32>
    %260 = vector.extract_strided_slice %248 {offsets = [15, 0], sizes = [1, 48], strides = [1, 1]} : vector<16x48xf32> to vector<1x48xf32>
    %261 = vector.extract_strided_slice %248 {offsets = [15, 0], sizes = [1, 48], strides = [1, 1]} : vector<16x48xf32> to vector<1x48xf32>
    %262 = tpu.concatenate %259, %260, %261 in 0 : vector<14x48xf32>, vector<1x48xf32>, vector<1x48xf32> -> vector<16x48xf32>
    %cst_45 = arith.constant 4.000000e-01 : f32
    %263 = vector.broadcast %cst_45 : f32 to vector<16x48xf32>
    %264 = arith.mulf %263, %248 : vector<16x48xf32>
    %265 = arith.addf %251, %254 : vector<16x48xf32>
    %cst_46 = arith.constant 2.500000e-01 : f32
    %266 = vector.broadcast %cst_46 : f32 to vector<16x48xf32>
    %267 = arith.mulf %266, %265 : vector<16x48xf32>
    %268 = arith.addf %264, %267 : vector<16x48xf32>
    %269 = arith.addf %258, %262 : vector<16x48xf32>
    %cst_47 = arith.constant 5.000000e-02 : f32
    %270 = vector.broadcast %cst_47 : f32 to vector<16x48xf32>
    %271 = arith.mulf %270, %269 : vector<16x48xf32>
    %272 = arith.addf %268, %271 : vector<16x48xf32>
    %273 = arith.subf %3, %272 : vector<16x48xf32>
    %274 = arith.subf %171, %273 : vector<16x48xf32>
    %275 = arith.mulf %274, %274 : vector<16x48xf32>
    %cst_48 = arith.constant 9.99999997E-7 : f32
    %276 = vector.broadcast %cst_48 : f32 to vector<16x48xf32>
    %277 = arith.addf %275, %276 : vector<16x48xf32>
    %278 = math.sqrt %277 : vector<16x48xf32>
    %cst_49 = arith.constant dense<0.000000e+00> : vector<48xf32>
    %279 = vector.multi_reduction <add>, %278, %cst_49 [0] : vector<16x48xf32> to vector<48xf32>
    %280 = vector.shape_cast %279 : vector<48xf32> to vector<1x48xf32>
    %c0_50 = arith.constant 0 : index
    %c0_51 = arith.constant 0 : index
    %c0_52 = arith.constant 0 : index
    %281 = vector.load %arg3[%c0_50, %c0_51, %c0_52] : memref<1x1x48xf32, #tpu.memory_space<vmem>>, vector<1x1x48xf32>
    %282 = vector.shape_cast %281 : vector<1x1x48xf32> to vector<1x48xf32>
    %283 = vector.shape_cast %280 : vector<1x48xf32> to vector<1x1x48xf32>
    tpu.vector_store %arg3[%c0_50, %c0_51, %c0_52], %283 {strides = array<i32>} : memref<1x1x48xf32, #tpu.memory_space<vmem>>, vector<1x1x48xf32>,
    return
  }
  func.func @transform_0(%arg0: i32) -> (i32, i32, i32) {
    %c0_i32 = arith.constant 0 : i32
    %c0_i32_0 = arith.constant 0 : i32
    %c0_i32_1 = arith.constant 0 : i32
    return %arg0, %c0_i32, %c0_i32_0 : i32, i32, i32
  }
  func.func @transform_1(%arg0: i32) -> (i32, i32, i32) {
    %c0_i32 = arith.constant 0 : i32
    %c0_i32_0 = arith.constant 0 : i32
    %c0_i32_1 = arith.constant 0 : i32
    return %arg0, %c0_i32, %c0_i32_0 : i32, i32, i32
  }
  func.func @transform_2(%arg0: i32) -> (i32, i32, i32) {
    %c0_i32 = arith.constant 0 : i32
    %c0_i32_0 = arith.constant 0 : i32
    %c0_i32_1 = arith.constant 0 : i32
    return %arg0, %c0_i32, %c0_i32_0 : i32, i32, i32
  }
}

</mosaic_0001>

<bundles_post_ra>
// kernel: edge_loss.1
= control target key start
LH: loop header
LB: loop body
LE: loop exit
PB: predicated region body
PF: predicated region fallthrough
CT: control target
= control target key end

     0   :  { %s781_s9 = smov 0   ;;  %s1123_s0 = inlined_call_operand.vmem [shape: f32[2,16,48], index: 0, kind: input, shape index: {}]   ;;  %s1124_s1 = inlined_call_operand.vmem [shape: f32[2,16,48], index: 1, kind: input, shape index: {}]   ;;  %s1125_s2 = inlined_call_operand.vmem [shape: f32[2,1,48], index: 2, kind: output, shape index: {}]  }
   0x1 LB: > { %s723_s10 = sadd.s32 4294967295, %s759_s9   ;;  %p727_p0 = scmp.ge.s32.totalorder %s759_s9, 1  ;;  %s759_s9 = sphi %s781_s9, %s12_s9  }
   0x2   : > { %p122_p1 = scmp.lt.s32.totalorder %s759_s9, 3 }
   0x4   : > { %p123_p2 = pnand %p727_p0, %p122_p1 }
   0x5   : > { %p147_p3 = scmp.lt.s32.totalorder (!%p123_p2), %s723_s10, 1  ;;  %s761_s15 = smov (!%p123_p2), 127  }
   0x6   : > { %126 = sbr.rel (%p123_p2) target bundleno = 387 (0x183), region = 28  ;;  %s762_s16 = smov (!%p123_p2), 1  }
   0x7   : > { %s763_s20 = smov (!%p123_p2), 2   ;;  %s764_s21 = smov (!%p123_p2), 126  }
   0xb   : > { %s1138_s10 = smov (!%p147_p3, %s723_s10), 1  ;;  %v164_v4 = vlaneseq  ;;  %vm247_vm0 = vcmask 384000   ;;  %vm236_vm1 = vcmask 7168   ;;  %vm258_vm4 = vcmask 15360  }
   0xc   : > { %s734_s11 = sshll.u32 %s1138_s10, 4  ;;  %vm269_vm7 = vcmask 375808   ;;  %vm290_vm8 = vcmask 1040384   ;;  %vm297_vm10 = vcmask 1046528   ;;  %vm304_vm11 = vcmask 1041408   ;;  %s159_s24 = scalar_lea.vmem %s1125_s2, %s1138_s10 }
   0xd   : > { %s151_s14 = scalar_lea.vmem %s1123_s0, %s734_s11  ;;  %s156_s19 = scalar_lea.vmem %s1124_s1, %s734_s11  ;;  %v165_v7 = vand.u32 127, %v164_v4  ;;  %v179_v25 = vshrl.u32 %v164_v4, 7  ;;  %vm311_vm13 = vcmask 1045504  }
   0xe   : > { %v795_v0 = vld [vmem:[%s151_s14] sm:$0xff]  ;;  %v801_v1 = vld [vmem:[%s151_s14 + $0x8] sm:$0xff] }
   0xf   : > { %241 = vrot.lane.b32.xlu1 %v795_v0, %s761_s15  ;;  %230 = vrot.lane.b32.xlu0 %v795_v0, %s762_s16  ;;  %v810_v2 = vld [vmem:[%s156_s19 + $0x8] sm:$0xff]  ;;  %v812_v3 = vld [vmem:[%s156_s19] sm:$0xff]  ;;  %v838_v10 = vand.u32 15, %v165_v7  ;;  %v274_v23 = vmul.f32 0.4, %v795_v0  ;;  %v180_v37 = vadd.s32 8, %v179_v25 }
  0x10   : > { %v275_v24 = vmul.f32 0.4, %v801_v1  ;;  %v865_v28 = vmul.f32 0.4, %v810_v2  ;;  %v868_v31 = vmul.f32 0.4, %v812_v3 }
  0x11   : > { %vm182_vm2 = vcmp.eq.s32.totalorder %v838_v10, 15  ;;  %vm181_vm3 = vcmp.eq.s32.totalorder %v838_v10, 0  ;;  %vm1126_vm5 = vcmp.le.s32.totalorder %v838_v10, 1  ;;  %vm184_vm6 = vcmp.ge.s32.totalorder %v838_v10, 14 }
  0x12   : > { %v215_v34 = vand.u32 1, %v838_v10  ;;  %v189_v38 = vand.u32 1, %v179_v25  ;;  %v196_v60 = vand.u32 1, %v180_v37 }
  0x13   : > { %243 = vrot.lane.b32.xlu1 %v801_v1, %s761_s15  ;;  %232 = vrot.lane.b32.xlu0 %v801_v1, %s762_s16 }
  0x14   : > { %vm917_vm9 = vcmp.eq.s32.totalorder %v215_v34, 0  ;;  %vm923_vm12 = vcmp.eq.s32.totalorder %v189_v38, 0  ;;  %vm927_vm14 = vcmp.eq.s32.totalorder %v196_v60, 0 }
  0x15   : > { %vm224_vm15 = vmand %vm923_vm12, %vm917_vm9 }
  0x17   : > { %438 = vrot.lane.b32.xlu1 %v810_v2, %s762_s16  ;;  %436 = vrot.lane.b32.xlu0 %v812_v3, %s762_s16 }
  0x1b   : > { %448 = vrot.lane.b32.xlu1 %v810_v2, %s761_s15  ;;  %446 = vrot.lane.b32.xlu0 %v812_v3, %s761_s15 }
  0x1f   : > { %254 = vrot.lane.b32.xlu1 %v801_v1, %s763_s20  ;;  %252 = vrot.lane.b32.xlu0 %v795_v0, %s763_s20 }
  0x23   : > { %265 = vrot.lane.b32.xlu1 %v801_v1, %s764_s21  ;;  %263 = vrot.lane.b32.xlu0 %v795_v0, %s764_s21 }
  0x27   : > { %458 = vrot.lane.b32.xlu1 %v810_v2, %s763_s20  ;;  %456 = vrot.lane.b32.xlu0 %v812_v3, %s763_s20 }
  0x2b   : > { %468 = vrot.lane.b32.xlu1 %v810_v2, %s764_s21  ;;  %466 = vrot.lane.b32.xlu0 %v812_v3, %s764_s21 }
  0x81   : > { %v242_v5 = vpop.permute.xlu1 %241  ;;  %v231_v6 = vpop.permute.xlu0 %230 }
  0x82   : > { %v248_v13 = vsel %vm247_vm0, %v242_v5, %v795_v0  ;;  %v237_v14 = vsel %vm236_vm1, %v795_v0, %v231_v6 }
  0x83   : > { %v250_v19 = vsel %vm182_vm2, %v795_v0, %v248_v13  ;;  %v239_v20 = vsel %vm181_vm3, %v795_v0, %v237_v14 }
  0x84   : > { %v276_v26 = vadd.f32 %v250_v19, %v239_v20 }
  0x85   : > { %v244_v8 = vpop.permute.xlu1 %243  ;;  %v233_v9 = vpop.permute.xlu0 %232 }
  0x86   : > { %v249_v15 = vsel %vm247_vm0, %v244_v8, %v801_v1  ;;  %v238_v16 = vsel %vm236_vm1, %v801_v1, %v233_v9  ;;  %v278_v39 = vmul.f32 0.25, %v276_v26 }
  0x87   : > { %v251_v21 = vsel %vm182_vm2, %v801_v1, %v249_v15  ;;  %v240_v22 = vsel %vm181_vm3, %v801_v1, %v238_v16 }
  0x88   : > { %v277_v27 = vadd.f32 %v251_v21, %v240_v22  ;;  %v280_v57 = vadd.f32 %v278_v39, %v274_v23 }
  0x89   : > { %v439_v11 = vpop.permute.xlu1 %438  ;;  %v437_v12 = vpop.permute.xlu0 %436 }
  0x8a   : > { %v279_v40 = vmul.f32 0.25, %v277_v27  ;;  %v443_v41 = vsel %vm236_vm1, %v810_v2, %v439_v11  ;;  %v442_v42 = vsel %vm236_vm1, %v812_v3, %v437_v12 }
  0x8b   : > { %v445_v53 = vsel %vm181_vm3, %v810_v2, %v443_v41  ;;  %v444_v54 = vsel %vm181_vm3, %v812_v3, %v442_v42 }
  0x8c   : > { %v281_v63 = vadd.f32 %v279_v40, %v275_v24 }
  0x8d   : > { %v449_v17 = vpop.permute.xlu1 %448  ;;  %v447_v18 = vpop.permute.xlu0 %446 }
  0x8e   : > { %v453_v32 = vsel %vm247_vm0, %v449_v17, %v810_v2  ;;  %v452_v33 = vsel %vm247_vm0, %v447_v18, %v812_v3 }
  0x8f   : > { %v888_v45 = vsel %vm182_vm2, %v810_v2, %v453_v32  ;;  %v893_v46 = vsel %vm182_vm2, %v812_v3, %v452_v33 }
  0x90   : > { %v479_v58 = vadd.f32 %v888_v45, %v445_v53  ;;  %v478_v59 = vadd.f32 %v893_v46, %v444_v54 }
  0x91   : > { %v255_v29 = vpop.permute.xlu1 %254  ;;  %v253_v30 = vpop.permute.xlu0 %252 }
  0x92   : > { %v260_v35 = vsel %vm258_vm4, %v801_v1, %v255_v29  ;;  %v259_v36 = vsel %vm258_vm4, %v795_v0, %v253_v30  ;;  %v481_v13 = vmul.f32 0.25, %v479_v58  ;;  %v480_v14 = vmul.f32 0.25, %v478_v59 }
  0x93   : > { %v262_v49 = vsel %vm1126_vm5, %v240_v22, %v260_v35  ;;  %v261_v50 = vsel %vm1126_vm5, %v239_v20, %v259_v36 }
  0x94   : > { %v482_v60 = vadd.f32 %v480_v14, %v868_v31 }
  0x95   : > { %v266_v43 = vpop.permute.xlu1 %265  ;;  %v264_v44 = vpop.permute.xlu0 %263 }
  0x96   : > { %v271_v47 = vsel %vm269_vm7, %v266_v43, %v801_v1  ;;  %v270_v48 = vsel %vm269_vm7, %v264_v44, %v795_v0 }
  0x97   : > { %v273_v51 = vsel %vm184_vm6, %v251_v21, %v271_v47  ;;  %v272_v52 = vsel %vm184_vm6, %v250_v19, %v270_v48 }
  0x98   : > { %v283_v55 = vadd.f32 %v273_v51, %v262_v49  ;;  %v282_v56 = vadd.f32 %v272_v52, %v261_v50 }
  0x99   : > { %v459_v61 = vpop.permute.xlu1 %458  ;;  %v457_v62 = vpop.permute.xlu0 %456 }
  0x9a   : > { %v285_v4 = vmul.f32 0.05, %v283_v55  ;;  %v284_v5 = vmul.f32 0.05, %v282_v56  ;;  %v463_v6 = vsel %vm258_vm4, %v810_v2, %v459_v61  ;;  %v462_v8 = vsel %vm258_vm4, %v812_v3, %v457_v62 }
  0x9b   : > { %v465_v16 = vsel %vm1126_vm5, %v445_v53, %v463_v6  ;;  %v464_v22 = vsel %vm1126_vm5, %v444_v54, %v462_v8  ;;  %vm225_vm5 = vmand %vm927_vm14, %vm917_vm9  ;;  %v765_v61 = vmov 0.0  }
  0x9c   : > { %v287_v9 = vadd.f32 %v285_v4, %v281_v63  ;;  %v286_v12 = vadd.f32 %v284_v5, %v280_v57  ;;  %v483_v57 = vadd.f32 %v481_v13, %v865_v28  ;;  %v227_v62 = vsel %vm225_vm5, 4.0, %v765_v61 }
  0x9d   : > { %v469_v17 = vpop.permute.xlu1 %468  ;;  %v467_v18 = vpop.permute.xlu0 %466  ;;  %vm1133_vm5 = vcmp.le.s32.totalorder %v838_v10, 1 }
  0x9e   : > { %v292_v19 = vrot.slane %v287_v9, 7  ;;  %v306_v20 = vrot.slane %v287_v9, 6  ;;  %v313_v21 = vrot.slane %v287_v9, 2  ;;  %v299_v23 = vrot.slane %v287_v9, 1  ;;  %vm1134_vm9 = vmmov %vm1133_vm5 }
  0x9f   : > { %v291_v24 = vrot.slane %v286_v12, 7  ;;  %v298_v25 = vrot.slane %v286_v12, 1  ;;  %v305_v26 = vrot.slane %v286_v12, 6  ;;  %v320_v27 = vmul.f32 0.4, %v287_v9 }
  0xa0   : > { %v312_v29 = vrot.slane %v286_v12, 2  ;;  %v473_v30 = vsel %vm269_vm7, %v469_v17, %v810_v2  ;;  %v472_v32 = vsel %vm269_vm7, %v467_v18, %v812_v3  ;;  %v303_v33 = vsel %vm297_vm10, %v299_v23, %v287_v9 }
  0xa1   : > { %v317_v34 = vsel %vm311_vm13, %v313_v21, %v299_v23  ;;  %v293_v35 = vsel %vm290_vm8, %v291_v24, %v292_v19  ;;  %v296_v36 = vsel %vm290_vm8, %v286_v12, %v291_v24  ;;  %v300_v38 = vsel %vm297_vm10, %v298_v25, %v299_v23 }
  0xa2   : > { %v318_v37 = vsel %vm297_vm10, %v317_v34, %v287_v9  ;;  %v307_v39 = vsel %vm304_vm11, %v305_v26, %v306_v20  ;;  %v310_v40 = vsel %vm304_vm11, %v296_v36, %v305_v26  ;;  %v314_v41 = vsel %vm311_vm13, %v312_v29, %v313_v21 }
  0xa3   : > { %v321_v42 = vadd.f32 %v300_v38, %v296_v36  ;;  %v322_v43 = vadd.f32 %v303_v33, %v293_v35  ;;  %v328_v44 = vadd.f32 %v318_v37, %v307_v39  ;;  %v319_v47 = vmul.f32 0.4, %v286_v12 }
  0xa4   : > { %v327_v48 = vadd.f32 %v314_v41, %v310_v40  ;;  %v475_v49 = vsel %vm184_vm6, %v888_v45, %v473_v30  ;;  %v474_v50 = vsel %vm184_vm6, %v893_v46, %v472_v32  ;;  %v226_v46 = vsel %vm224_vm15, 4.0, %v765_v61 }
  0xa5   : > { %v323_v51 = vmul.f32 0.25, %v321_v42  ;;  %v324_v52 = vmul.f32 0.25, %v322_v43  ;;  %v330_v53 = vmul.f32 0.05, %v328_v44  ;;  %v485_v54 = vadd.f32 %v475_v49, %v465_v16 }
  0xa6   : > { %v329_v55 = vmul.f32 0.05, %v327_v48  ;;  %v484_v56 = vadd.f32 %v474_v50, %v464_v22 }
  0xa7   : > { %v325_v58 = vadd.f32 %v323_v51, %v319_v47  ;;  %v326_v59 = vadd.f32 %v324_v52, %v320_v27  ;;  %v487_v45 = vmul.f32 0.05, %v485_v54 }
  0xa8   : > { %v486_v63 = vmul.f32 0.05, %v484_v56 }
  0xa9   : > { %v331_v4 = vadd.f32 %v329_v55, %v325_v58  ;;  %v332_v5 = vadd.f32 %v330_v53, %v326_v59  ;;  %v489_v6 = vadd.f32 %v487_v45, %v483_v57 }
  0xaa   : > { %v488_v8 = vadd.f32 %v486_v63, %v482_v60 }
  0xab   : > { %v969_v9 = vmul.f32 %v331_v4, %v226_v46  ;;  %v971_v28 = vmul.f32 %v332_v5, %v227_v62  ;;  %v493_v12 = vrot.slane %v489_v6, 7  ;;  %v505_v13 = vrot.slane %v489_v6, 6 }
  0xac   : > { %v511_v31 = vrot.slane %v489_v6, 2  ;;  %v499_v14 = vrot.slane %v489_v6, 1  ;;  %v492_v15 = vrot.slane %v488_v8, 7  ;;  %v498_v11 = vrot.slane %v488_v8, 1 }
  0xad   : > { %v504_v16 = vrot.slane %v488_v8, 6  ;;  %v510_v7 = vrot.slane %v488_v8, 2  ;;  %337 = vrot.lane.b32.xlu0 %v969_v9, %s762_s16  ;;  %339 = vrot.lane.b32.xlu1 %v971_v28, %s762_s16  ;;  %v518_v30 = vmul.f32 0.4, %v489_v6  ;;  %v517_v33 = vmul.f32 0.4, %v488_v8 }
  0xae   : > { %v503_v17 = vsel %vm297_vm10, %v499_v14, %v489_v6  ;;  %v515_v18 = vsel %vm311_vm13, %v511_v31, %v499_v14  ;;  %v494_v19 = vsel %vm290_vm8, %v492_v15, %v493_v12  ;;  %v497_v20 = vsel %vm290_vm8, %v488_v8, %v492_v15 }
  0xaf   : > { %v516_v21 = vsel %vm297_vm10, %v515_v18, %v489_v6  ;;  %v500_v22 = vsel %vm297_vm10, %v498_v11, %v499_v14  ;;  %v506_v23 = vsel %vm304_vm11, %v504_v16, %v505_v13  ;;  %v509_v24 = vsel %vm304_vm11, %v497_v20, %v504_v16 }
  0xb0   : > { %v512_v25 = vsel %vm311_vm13, %v510_v7, %v511_v31  ;;  %v519_v26 = vadd.f32 %v500_v22, %v497_v20  ;;  %v520_v27 = vadd.f32 %v503_v17, %v494_v19  ;;  %v526_v29 = vadd.f32 %v516_v21, %v506_v23 }
  0xb1   : > { %v525_v32 = vadd.f32 %v512_v25, %v509_v24  ;;  %347 = vrot.lane.b32.xlu0 %v969_v9, %s761_s15  ;;  %349 = vrot.lane.b32.xlu1 %v971_v28, %s761_s15  ;;  %v377_v6 = vmul.f32 0.4, %v969_v9  ;;  %v378_v14 = vmul.f32 0.4, %v971_v28 }
  0xb2   : > { %v521_v34 = vmul.f32 0.25, %v519_v26  ;;  %v522_v35 = vmul.f32 0.25, %v520_v27  ;;  %v528_v36 = vmul.f32 0.05, %v526_v29 }
  0xb3   : > { %v527_v37 = vmul.f32 0.05, %v525_v32 }
  0xb4   : > { %v523_v38 = vadd.f32 %v521_v34, %v517_v33  ;;  %v524_v39 = vadd.f32 %v522_v35, %v518_v30 }
  0xb6   : > { %v529_v40 = vadd.f32 %v527_v37, %v523_v38  ;;  %v530_v41 = vadd.f32 %v528_v36, %v524_v39 }
  0xb8   : > { %v990_v42 = vmul.f32 %v529_v40, %v226_v46  ;;  %v992_v43 = vmul.f32 %v530_v41, %v227_v62 }
  0xba   : > { %535 = vrot.lane.b32.xlu0 %v990_v42, %s762_s16  ;;  %537 = vrot.lane.b32.xlu1 %v992_v43, %s762_s16 }
  0xbe   : > { %545 = vrot.lane.b32.xlu0 %v990_v42, %s761_s15  ;;  %547 = vrot.lane.b32.xlu1 %v992_v43, %s761_s15 }
  0xc2   : > { %357 = vrot.lane.b32.xlu0 %v969_v9, %s763_s20  ;;  %359 = vrot.lane.b32.xlu1 %v971_v28, %s763_s20 }
  0xc6   : > { %367 = vrot.lane.b32.xlu0 %v969_v9, %s764_s21  ;;  %369 = vrot.lane.b32.xlu1 %v971_v28, %s764_s21 }
  0xca   : > { %555 = vrot.lane.b32.xlu0 %v990_v42, %s763_s20  ;;  %557 = vrot.lane.b32.xlu1 %v992_v43, %s763_s20 }
  0xce   : > { %565 = vrot.lane.b32.xlu0 %v990_v42, %s764_s21  ;;  %567 = vrot.lane.b32.xlu1 %v992_v43, %s764_s21 }
 0x11f   : > { %v338_v44 = vpop.permute.xlu0 %337  ;;  %v340_v47 = vpop.permute.xlu1 %339 }
 0x120   : > { %v343_v54 = vsel %vm236_vm1, %v969_v9, %v338_v44  ;;  %v344_v55 = vsel %vm236_vm1, %v971_v28, %v340_v47 }
 0x121   : > { %v345_v45 = vsel %vm181_vm3, %v969_v9, %v343_v54  ;;  %v346_v60 = vsel %vm181_vm3, %v971_v28, %v344_v55 }
 0x123   : > { %v348_v48 = vpop.permute.xlu0 %347  ;;  %v350_v49 = vpop.permute.xlu1 %349 }
 0x124   : > { %v353_v52 = vsel %vm247_vm0, %v348_v48, %v969_v9  ;;  %v354_v53 = vsel %vm247_vm0, %v350_v49, %v971_v28  ;;  %v575_v49 = vmul.f32 0.4, %v990_v42 }
 0x125   : > { %v355_v58 = vsel %vm182_vm2, %v969_v9, %v353_v52  ;;  %v356_v59 = vsel %vm182_vm2, %v971_v28, %v354_v53 }
 0x126   : > { %v379_v61 = vadd.f32 %v355_v58, %v345_v45  ;;  %v380_v46 = vadd.f32 %v356_v59, %v346_v60 }
 0x128   : > { %v381_v8 = vmul.f32 0.25, %v379_v61  ;;  %v382_v12 = vmul.f32 0.25, %v380_v46 }
 0x12a   : > { %v383_v22 = vadd.f32 %v381_v8, %v377_v6  ;;  %v384_v23 = vadd.f32 %v382_v12, %v378_v14 }
 0x12c   : > { %v536_v50 = vpop.permute.xlu0 %535  ;;  %v538_v51 = vpop.permute.xlu1 %537 }
 0x12d   : > { %v542_v25 = vsel %vm236_vm1, %v992_v43, %v538_v51 }
 0x12e   : > { %v544_v36 = vsel %vm181_vm3, %v992_v43, %v542_v25 }
 0x130   : > { %v546_v56 = vpop.permute.xlu0 %545  ;;  %v548_v57 = vpop.permute.xlu1 %547 }
 0x131   : > { %v551_v15 = vsel %vm247_vm0, %v546_v56, %v990_v42  ;;  %v552_v20 = vsel %vm247_vm0, %v548_v57, %v992_v43  ;;  %vm1135_vm0 = vmmov %vm1133_vm5 }
 0x132   : > { %v553_v26 = vsel %vm182_vm2, %v990_v42, %v551_v15  ;;  %v554_v30 = vsel %vm182_vm2, %v992_v43, %v552_v20  ;;  %vm652_vm2 = vcmask 392192  }
 0x133   : > { %v578_v39 = vadd.f32 %v554_v30, %v544_v36 }
 0x134   : > { %v358_v62 = vpop.permute.xlu0 %357  ;;  %v360_v63 = vpop.permute.xlu1 %359 }
 0x135   : > { %v363_v4 = vsel %vm258_vm4, %v969_v9, %v358_v62  ;;  %v364_v5 = vsel %vm258_vm4, %v971_v28, %v360_v63  ;;  %v580_v57 = vmul.f32 0.25, %v578_v39 }
 0x136   : > { %v365_v7 = vsel %vm1133_vm5, %v345_v45, %v363_v4  ;;  %v366_v17 = vsel %vm1134_vm9, %v346_v60, %v364_v5 }
 0x138   : > { %v368_v13 = vpop.permute.xlu0 %367  ;;  %v370_v31 = vpop.permute.xlu1 %369 }
 0x139   : > { %v373_v11 = vsel %vm269_vm7, %v368_v13, %v969_v9  ;;  %v374_v16 = vsel %vm269_vm7, %v370_v31, %v971_v28  ;;  %v541_v28 = vsel %vm236_vm1, %v990_v42, %v536_v50  ;;  %vm1136_vm1 = vmmov %vm1135_vm0 }
 0x13a   : > { %v375_v18 = vsel %vm184_vm6, %v355_v58, %v373_v11  ;;  %v376_v19 = vsel %vm184_vm6, %v356_v59, %v374_v16  ;;  %v543_v33 = vsel %vm181_vm3, %v990_v42, %v541_v28  ;;  %v576_v16 = vmul.f32 0.4, %v992_v43 }
 0x13b   : > { %v385_v21 = vadd.f32 %v375_v18, %v365_v7  ;;  %v386_v9 = vadd.f32 %v376_v19, %v366_v17  ;;  %v577_v37 = vadd.f32 %v553_v26, %v543_v33 }
 0x13c   : > { %v556_v24 = vpop.permute.xlu0 %555  ;;  %v558_v32 = vpop.permute.xlu1 %557 }
 0x13d   : > { %v387_v27 = vmul.f32 0.05, %v385_v21  ;;  %v388_v29 = vmul.f32 0.05, %v386_v9  ;;  %v561_v48 = vsel %vm258_vm4, %v990_v42, %v556_v24  ;;  %v579_v52 = vmul.f32 0.25, %v577_v37 }
 0x13e   : > { %v562_v55 = vsel %vm258_vm4, %v992_v43, %v558_v32  ;;  %v563_v45 = vsel %vm1135_vm0, %v543_v33, %v561_v48  ;;  %v582_v21 = vadd.f32 %v580_v57, %v576_v16 }
 0x13f   : > { %v389_v34 = vadd.f32 %v387_v27, %v383_v22  ;;  %v390_v35 = vadd.f32 %v388_v29, %v384_v23  ;;  %v564_v63 = vsel %vm1136_vm1, %v544_v36, %v562_v55  ;;  %v581_v31 = vadd.f32 %v579_v52, %v575_v49 }
 0x140   : > { %v566_v38 = vpop.permute.xlu0 %565  ;;  %v568_v56 = vpop.permute.xlu1 %567 }
 0x141   : > { %v393_v40 = vrot.slane %v389_v34, 7  ;;  %v399_v41 = vrot.slane %v389_v34, 1  ;;  %v394_v44 = vrot.slane %v390_v35, 7  ;;  %v400_v47 = vrot.slane %v390_v35, 1 }
 0x142   : > { %v412_v50 = vrot.slane %v390_v35, 2  ;;  %v571_v51 = vsel %vm269_vm7, %v566_v38, %v990_v42  ;;  %v405_v53 = vrot.slane %v389_v34, 6  ;;  %v411_v54 = vrot.slane %v389_v34, 2 }
 0x143   : > { %v398_v58 = vsel %vm290_vm8, %v389_v34, %v393_v40  ;;  %v401_v59 = vsel %vm297_vm10, %v399_v41, %v400_v47  ;;  %v395_v60 = vsel %vm290_vm8, %v393_v40, %v394_v44  ;;  %v404_v61 = vsel %vm297_vm10, %v400_v47, %v390_v35 }
 0x144   : > { %v406_v42 = vrot.slane %v390_v35, 6  ;;  %v573_v46 = vsel %vm184_vm6, %v553_v26, %v571_v51  ;;  %v416_v62 = vsel %vm311_vm13, %v412_v50, %v400_v47  ;;  %v572_v5 = vsel %vm269_vm7, %v568_v56, %v992_v43 }
 0x145   : > { %v583_v4 = vadd.f32 %v573_v46, %v563_v45  ;;  %v410_v6 = vsel %vm304_vm11, %v398_v58, %v405_v53  ;;  %v413_v8 = vsel %vm311_vm13, %v411_v54, %v412_v50  ;;  %v420_v12 = vadd.f32 %v401_v59, %v398_v58 }
 0x146   : > { %v574_v13 = vsel %vm184_vm6, %v554_v30, %v572_v5  ;;  %v421_v14 = vadd.f32 %v404_v61, %v395_v60  ;;  %v407_v7 = vsel %vm304_vm11, %v405_v53, %v406_v42  ;;  %v417_v17 = vsel %vm297_vm10, %v416_v62, %v390_v35 }
 0x147   : > { %v585_v15 = vmul.f32 0.05, %v583_v4  ;;  %v584_v11 = vadd.f32 %v574_v13, %v564_v63  ;;  %v426_v18 = vadd.f32 %v413_v8, %v410_v6  ;;  %v422_v9 = vmul.f32 0.25, %v420_v12 }
 0x148   : > { %v423_v22 = vmul.f32 0.25, %v421_v14  ;;  %v427_v23 = vadd.f32 %v417_v17, %v407_v7  ;;  %v418_v24 = vmul.f32 0.4, %v389_v34  ;;  %v419_v27 = vmul.f32 0.4, %v390_v35 }
 0x149   : > { %v587_v19 = vadd.f32 %v585_v15, %v581_v31  ;;  %v586_v20 = vmul.f32 0.05, %v584_v11  ;;  %v428_v29 = vmul.f32 0.05, %v426_v18 }
 0x14a   : > { %v424_v32 = vadd.f32 %v422_v9, %v418_v24  ;;  %v425_v38 = vadd.f32 %v423_v22, %v419_v27  ;;  %v429_v39 = vmul.f32 0.05, %v427_v23 }
 0x14b   : > { %v591_v28 = vrot.slane %v587_v19, 7  ;;  %v603_v10 = vrot.slane %v587_v19, 6  ;;  %v597_v25 = vrot.slane %v587_v19, 1  ;;  %v588_v26 = vadd.f32 %v586_v20, %v582_v21 }
 0x14c   : > { %v609_v30 = vrot.slane %v587_v19, 2  ;;  %v616_v52 = vmul.f32 0.4, %v587_v19  ;;  %v430_v59 = vadd.f32 %v428_v29, %v424_v32  ;;  %v431_v60 = vadd.f32 %v429_v39, %v425_v38 }
 0x14d   : > { %v596_v43 = vsel %vm290_vm8, %v587_v19, %v591_v28  ;;  %v592_v33 = vrot.slane %v588_v26, 7  ;;  %v598_v36 = vrot.slane %v588_v26, 1  ;;  %v604_v37 = vrot.slane %v588_v26, 6 }
 0x14e   : > { %v608_v40 = vsel %vm304_vm11, %v596_v43, %v603_v10  ;;  %v610_v41 = vrot.slane %v588_v26, 2  ;;  %v617_v55 = vmul.f32 0.4, %v588_v26  ;;  %v432_v4 = vsub.f32 %v795_v0, %v430_v59 }
 0x14f   : > { %v593_v44 = vsel %vm290_vm8, %v591_v28, %v592_v33  ;;  %v599_v34 = vsel %vm297_vm10, %v597_v25, %v598_v36  ;;  %v602_v47 = vsel %vm297_vm10, %v598_v36, %v588_v26  ;;  %v605_v35 = vsel %vm304_vm11, %v603_v10, %v604_v37 }
 0x150   : > { %v611_v48 = vsel %vm311_vm13, %v609_v30, %v610_v41  ;;  %v614_v49 = vsel %vm311_vm13, %v610_v41, %v598_v36  ;;  %v618_v50 = vadd.f32 %v599_v34, %v596_v43  ;;  %v619_v51 = vadd.f32 %v602_v47, %v593_v44 }
 0x151   : > { %v615_v53 = vsel %vm297_vm10, %v614_v49, %v588_v26  ;;  %v624_v54 = vadd.f32 %v611_v48, %v608_v40  ;;  %v433_v5 = vsub.f32 %v801_v1, %v431_v60  ;;  %vm662_vm8 = vcmask 385024  }
 0x152   : > { %v620_v56 = vmul.f32 0.25, %v618_v50  ;;  %v621_v57 = vmul.f32 0.25, %v619_v51  ;;  %v625_v58 = vadd.f32 %v615_v53, %v605_v35 }
 0x153   : > { %v626_v45 = vmul.f32 0.05, %v624_v54 }
 0x154   : > { %v622_v61 = vadd.f32 %v620_v56, %v616_v52  ;;  %v623_v42 = vadd.f32 %v621_v57, %v617_v55  ;;  %v627_v46 = vmul.f32 0.05, %v625_v58 }
 0x156   : > { %v628_v62 = vadd.f32 %v626_v45, %v622_v61  ;;  %v629_v63 = vadd.f32 %v627_v46, %v623_v42 }
 0x158   : > { %v630_v6 = vsub.f32 %v812_v3, %v628_v62  ;;  %v631_v8 = vsub.f32 %v810_v2, %v629_v63 }
 0x15a   : > { %v632_v12 = vsub.f32 %v432_v4, %v630_v6  ;;  %v633_v13 = vsub.f32 %v433_v5, %v631_v8 }
 0x15c   : > { %v634_v31 = vmul.f32 %v632_v12, %v632_v12  ;;  %v635_v14 = vmul.f32 %v633_v13, %v633_v13 }
 0x15e   : > { %v636_v15 = vadd.f32 1e-06, %v634_v31  ;;  %v637_v11 = vadd.f32 1e-06, %v635_v14 }
 0x160   : > { %749 = vrsqrt.f32 %v636_v15  ;;  %vm640_vm3 = vcmp.eq.f32.partialorder %v636_v15, inf  ;;  %v643_v0 = vand.u32 2147483648, %v636_v15  ;;  %vm642_vm4 = vcmp.eq.f32.partialorder %v636_v15, 0.0 }
 0x161   : > { %751 = vrsqrt.f32 %v637_v11  ;;  %vm647_vm6 = vcmp.eq.f32.partialorder %v637_v11, inf  ;;  %v650_v2 = vand.u32 2147483648, %v637_v11  ;;  %vm649_vm7 = vcmp.eq.f32.partialorder %v637_v11, 0.0 }
 0x16d   : > { %v750_v16 = vpop.eup %749 }
 0x16e   : > { %v752_v7 = vpop.eup %751  ;;  %v639_v17 = vmul.f32 %v750_v16, %v636_v15 }
 0x16f   : > { %v646_v18 = vmul.f32 %v752_v7, %v637_v11 }
 0x170   : > { %v641_v1 = vsel %vm640_vm3, %v636_v15, %v639_v17 }
 0x171   : > { %v644_v3 = vsel %vm642_vm4, %v643_v0, %v641_v1  ;;  %v648_v19 = vsel %vm647_vm6, %v637_v11, %v646_v18 }
 0x172   : > { %v651_v20 = vsel %vm649_vm7, %v650_v2, %v648_v19  ;;  %v653_v21 = vsel %vm652_vm2, %v644_v3, 0.0 }
 0x173   : > { %v654_v9 = vsel %vm652_vm2, %v651_v20, 0.0 }
 0x174   : > { %v655_v22 = vadd.f32 %v654_v9, %v653_v21 }
 0x176   : > { %v656_v23 = vrot.slane %v655_v22, 4 }
 0x178   : > { %v657_v28 = vadd.f32 %v656_v23, %v655_v22 }
 0x17a   : > { %v658_v10 = vrot.slane %v657_v28, 2 }
 0x17c   : > { %v659_v24 = vadd.f32 %v658_v10, %v657_v28 }
 0x17e   : > { %v660_v25 = vrot.slane %v659_v24, 1 }
 0x180   : > { %v661_v26 = vadd.f32 %v660_v25, %v659_v24 }
 0x182   : > { %663 = vst.msk [vmem:[%s159_s24] sm:$0x1] %vm662_vm8, %v661_v26 }
 0x183 PF: > { %s12_s9 = sadd.s32 1, %s759_s9  }
 0x184   : > { %p9_p4 = scmp.ge.s32.totalorder %s12_s9, 4  }
 0x186   :  { %11 = sbr.rel (!%p9_p4) target bundleno = 1 (0x1), region = 61 }

</bundles_post_ra>
